<compile_context>
chip_gen: v7x
topology: tpu7x:2x2x1
jax: 0.10.0
libtpu: 0.0.40
codegen_flags: <defaults>
</compile_context>

<pallas_src>
import functools

import jax
import jax.numpy as jnp
import numpy as np
from jax.experimental import pallas as pl
from jax.experimental.pallas import tpu as pltpu


def _subpointconv_mlp_kernel(x_ref, w1_ref, b1_ref, w2_ref, b2_ref, o_ref,
                             *, compute_dtype):
    # x_ref : (1, cg_in, tM)   one batch element, one lane tile of the (n*g) axis
    # w1    : (H, cg_in)       b1: (H, 1)
    # w2    : (cg_out, H)      b2: (cg_out, 1)
    # o_ref : (1, cg_out, tM)
    x = x_ref[0].astype(compute_dtype)                       # (cg_in, tM)
    w1 = w1_ref[...].astype(compute_dtype)                   # (H, cg_in)
    w2 = w2_ref[...].astype(compute_dtype)                   # (cg_out, H)
    h = jnp.dot(w1, x, preferred_element_type=jnp.float32) + b1_ref[...]
    h = jnp.maximum(h, 0.0).astype(compute_dtype)            # ReLU, bf16 for 2nd MXU pass
    out = jnp.dot(w2, h, preferred_element_type=jnp.float32) + b2_ref[...]
    o_ref[0] = out.astype(o_ref.dtype)                       # (cg_out, tM)


def _round_up(x, m):
    return ((x + m - 1) // m) * m


def _pick_tile(m, *, max_tile=32768, min_m_steps=1):
    """Largest lane-dense (multiple-of-128) tile <= max_tile covering m.

    Optionally capped so the M axis yields >= min_m_steps grid steps (keeps both
    v7x TensorCores busy when the batch axis alone cannot).
    """
    m_lanes = _round_up(max(m, 1), 128)
    tile = min(max_tile, m_lanes)
    if min_m_steps > 1:
        cap = max(128, (m_lanes // min_m_steps) // 128 * 128)
        tile = min(tile, cap)
    return max(128, (tile // 128) * 128)


def sub_point_conv_mlp_forward(feats, params, *, group_num,
                               compute_dtype=jnp.bfloat16, max_tile=32768):
    """feats: (B, in_fdim, N) float32. Returns (B, out_fdim//group_num, N, group_num)."""
    w1, b1, w2, b2 = params            # (H, cg_in), (H, 1), (cg_out, H), (cg_out, 1)
    B, C, N = feats.shape
    assert C % group_num == 0, "in_fdim must be divisible by group_num"
    cg_in = C // group_num
    H = w1.shape[0]
    cg_out = w2.shape[0]
    M = group_num * N

    # 'b (c g) n -> b c (n g)': one transpose pass over the (smaller) input so the
    # kernel's flat output is n-major and reshapes to 'b c n g' with NO extra pass.
    x = jnp.transpose(feats.reshape(B, cg_in, group_num, N), (0, 1, 3, 2))
    x = x.reshape(B, cg_in, M)

    tM = _pick_tile(M, max_tile=max_tile, min_m_steps=1 if B >= 2 else 2)
    M_pad = _round_up(M, tM)
    if M_pad != M:
        x = jnp.pad(x, ((0, 0), (0, 0), (0, M_pad - M)))
    grid = (B, M_pad // tM)

    kernel = functools.partial(_subpointconv_mlp_kernel, compute_dtype=compute_dtype)

    out_flat = pl.pallas_call(
        kernel,
        out_shape=jax.ShapeDtypeStruct((B, cg_out, M_pad), feats.dtype),
        grid_spec=pltpu.PrefetchScalarGridSpec(
            num_scalar_prefetch=0,
            grid=grid,
            in_specs=[
                pl.BlockSpec((1, cg_in, tM), lambda b, m: (b, 0, m)),   # x tile
                pl.BlockSpec((H, cg_in), lambda b, m: (0, 0)),          # w1
                pl.BlockSpec((H, 1), lambda b, m: (0, 0)),              # b1
                pl.BlockSpec((cg_out, H), lambda b, m: (0, 0)),         # w2
                pl.BlockSpec((cg_out, 1), lambda b, m: (0, 0)),         # b2
            ],
            out_specs=pl.BlockSpec((1, cg_out, tM), lambda b, m: (b, 0, m)),
        ),
        compiler_params=pltpu.CompilerParams(
            dimension_semantics=("parallel", "parallel"),
            vmem_limit_bytes=32 * 1024 * 1024,
        ),
    )(x, w1, b1, w2, b2)

    if M_pad != M:
        out_flat = out_flat[:, :, :M]
    # (B, cg_out, N*g) -> (B, cg_out, N, g): pure row-major split, free.
    return out_flat.reshape(B, cg_out, N, group_num)


def sub_point_conv_mlp_reference(feats, params, *, group_num):
    """Pure-JAX f32 reference of the PyTorch forward (mlp mode)."""
    w1, b1, w2, b2 = params
    B, C, N = feats.shape
    cg_in = C // group_num
    # rearrange 'b (c g) n -> b c n g'
    xg = jnp.transpose(feats.reshape(B, cg_in, group_num, N), (0, 1, 3, 2))
    h = jnp.einsum("hc,bcng->bhng", w1, xg, precision="highest") \
        + b1[:, 0][None, :, None, None]
    h = jnp.maximum(h, 0.0)
    out = jnp.einsum("oh,bhng->bong", w2, h, precision="highest") \
        + b2[:, 0][None, :, None, None]
    return out                                               # (B, c_out, n, g)


if __name__ == "__main__":
    # Small, module-consistent shapes:
    #   args.hidden_dim = 32, args.sub_point_conv_mode = 'mlp'
    #   in_fdim = 32, out_fdim = 64, group_num = 4, n_points = 64
    B, N = 2, 64
    IN_FDIM, OUT_FDIM, HIDDEN, GROUP_NUM = 32, 64, 32, 4
    CG_IN = IN_FDIM // GROUP_NUM        # 8
    CG_OUT = OUT_FDIM // GROUP_NUM      # 16

    key = jax.random.PRNGKey(0)
    kx, k1, k2, k3, k4 = jax.random.split(key, 5)

    feats = jax.random.normal(kx, (B, IN_FDIM, N), dtype=jnp.float32)

    # Conv2d(CG_IN, HIDDEN, 1): weight (HIDDEN, CG_IN, 1, 1) -> (HIDDEN, CG_IN), bias (HIDDEN,)
    w1 = 0.2 * jax.random.normal(k1, (HIDDEN, CG_IN), dtype=jnp.float32)
    b1 = 0.1 * jax.random.normal(k2, (HIDDEN, 1), dtype=jnp.float32)
    # Conv2d(HIDDEN, CG_OUT, 1): weight (CG_OUT, HIDDEN, 1, 1) -> (CG_OUT, HIDDEN), bias (CG_OUT,)
    w2 = 0.2 * jax.random.normal(k3, (CG_OUT, HIDDEN), dtype=jnp.float32)
    b2 = 0.1 * jax.random.normal(k4, (CG_OUT, 1), dtype=jnp.float32)
    params = (w1, b1, w2, b2)

    out = sub_point_conv_mlp_forward(feats, params, group_num=GROUP_NUM)
    out = jax.block_until_ready(out)

    ref = sub_point_conv_mlp_reference(feats, params, group_num=GROUP_NUM)
    assert out.shape == (B, CG_OUT, N, GROUP_NUM)
    # bf16 MXU operands with f32 accumulation -> ~1e-2-level deviations vs the
    # f32 'highest' reference for O(1) activations; 2e-2 tolerance is comfortable.
    np.testing.assert_allclose(np.asarray(out), np.asarray(ref), rtol=2e-2, atol=2e-2)

    print("KERNEL_OK")
</pallas_src>

<mosaic_0001>
module attributes {stable_mosaic.version = 11 : i64} {
  func.func @_subpointconv_mlp_kernel(%arg0: i32, %arg1: i32, %arg2: memref<1x8x256xf32, #tpu.memory_space<vmem>>, %arg3: memref<32x8xf32, #tpu.memory_space<vmem>>, %arg4: memref<32x1xf32, #tpu.memory_space<vmem>>, %arg5: memref<16x32xf32, #tpu.memory_space<vmem>>, %arg6: memref<16x1xf32, #tpu.memory_space<vmem>>, %arg7: memref<1x16x256xf32, #tpu.memory_space<vmem>>) attributes {dimension_semantics = [#tpu.dimension_semantics<parallel>, #tpu.dimension_semantics<parallel>], iteration_bounds = array<i64: 2, 1>, scalar_prefetch = 0 : i64, scratch_operands = 0 : i64, tpu.core_type = #tpu.core_type<tc>, window_params = [{transform_indices = @transform_0, window_bounds = array<i64: 1, 8, 256>}, {pipeline_mode = #tpu.pipeline_mode<synchronous>, transform_indices = @transform_1, window_bounds = array<i64: 32, 8>}, {pipeline_mode = #tpu.pipeline_mode<synchronous>, transform_indices = @transform_2, window_bounds = array<i64: 32, 1>}, {pipeline_mode = #tpu.pipeline_mode<synchronous>, transform_indices = @transform_3, window_bounds = array<i64: 16, 32>}, {pipeline_mode = #tpu.pipeline_mode<synchronous>, transform_indices = @transform_4, window_bounds = array<i64: 16, 1>}, {transform_indices = @transform_5, window_bounds = array<i64: 1, 16, 256>}]} {
    %c0 = arith.constant 0 : index
    %c0_0 = arith.constant 0 : index
    %c0_1 = arith.constant 0 : index
    %0 = vector.load %arg2[%c0, %c0_0, %c0_1] : memref<1x8x256xf32, #tpu.memory_space<vmem>>, vector<1x8x256xf32>
    %1 = vector.shape_cast %0 : vector<1x8x256xf32> to vector<8x256xf32>
    %2 = arith.truncf %1 : vector<8x256xf32> to vector<8x256xbf16>
    %c0_2 = arith.constant 0 : index
    %c0_3 = arith.constant 0 : index
    %3 = vector.load %arg3[%c0_2, %c0_3] : memref<32x8xf32, #tpu.memory_space<vmem>>, vector<32x8xf32>
    %4 = arith.truncf %3 : vector<32x8xf32> to vector<32x8xbf16>
    %c0_4 = arith.constant 0 : index
    %c0_5 = arith.constant 0 : index
    %5 = vector.load %arg5[%c0_4, %c0_5] : memref<16x32xf32, #tpu.memory_space<vmem>>, vector<16x32xf32>
    %6 = arith.truncf %5 : vector<16x32xf32> to vector<16x32xbf16>
    %cst = arith.constant dense<0.000000e+00> : vector<32x256xf32>
    %7 = tpu.matmul %4, %2, %cst {dimension_numbers = #tpu.dot_dimension_numbers<[1], [0], [0], [1], [0, 0, 1, 1], [], []>} : vector<32x8xbf16>, vector<8x256xbf16>, vector<32x256xf32> -> vector<32x256xf32>
    %c0_6 = arith.constant 0 : index
    %c0_7 = arith.constant 0 : index
    %8 = vector.load %arg4[%c0_6, %c0_7] : memref<32x1xf32, #tpu.memory_space<vmem>>, vector<32x1xf32>
    %9 = vector.broadcast %8 : vector<32x1xf32> to vector<32x256xf32>
    %10 = arith.addf %7, %9 : vector<32x256xf32>
    %cst_8 = arith.constant 0.000000e+00 : f32
    %11 = vector.broadcast %cst_8 : f32 to vector<32x256xf32>
    %12 = arith.maximumf %10, %11 : vector<32x256xf32>
    %13 = arith.truncf %12 : vector<32x256xf32> to vector<32x256xbf16>
    %cst_9 = arith.constant dense<0.000000e+00> : vector<16x256xf32>
    %14 = tpu.matmul %6, %13, %cst_9 {dimension_numbers = #tpu.dot_dimension_numbers<[1], [0], [0], [1], [0, 0, 1, 1], [], []>} : vector<16x32xbf16>, vector<32x256xbf16>, vector<16x256xf32> -> vector<16x256xf32>
    %c0_10 = arith.constant 0 : index
    %c0_11 = arith.constant 0 : index
    %15 = vector.load %arg6[%c0_10, %c0_11] : memref<16x1xf32, #tpu.memory_space<vmem>>, vector<16x1xf32>
    %16 = vector.broadcast %15 : vector<16x1xf32> to vector<16x256xf32>
    %17 = arith.addf %14, %16 : vector<16x256xf32>
    %c0_12 = arith.constant 0 : index
    %c0_13 = arith.constant 0 : index
    %c0_14 = arith.constant 0 : index
    %18 = vector.load %arg7[%c0_12, %c0_13, %c0_14] : memref<1x16x256xf32, #tpu.memory_space<vmem>>, vector<1x16x256xf32>
    %19 = vector.shape_cast %18 : vector<1x16x256xf32> to vector<16x256xf32>
    %20 = vector.shape_cast %17 : vector<16x256xf32> to vector<1x16x256xf32>
    tpu.vector_store %arg7[%c0_12, %c0_13, %c0_14], %20 {strides = array<i32>} : memref<1x16x256xf32, #tpu.memory_space<vmem>>, vector<1x16x256xf32>,
    return
  }
  func.func @transform_0(%arg0: i32, %arg1: i32) -> (i32, i32, i32) {
    %c0_i32 = arith.constant 0 : i32
    %c0_i32_0 = arith.constant 0 : i32
    return %arg0, %c0_i32, %arg1 : i32, i32, i32
  }
  func.func @transform_1(%arg0: i32, %arg1: i32) -> (i32, i32) {
    %c0_i32 = arith.constant 0 : i32
    %c0_i32_0 = arith.constant 0 : i32
    %c0_i32_1 = arith.constant 0 : i32
    return %c0_i32, %c0_i32_0 : i32, i32
  }
  func.func @transform_2(%arg0: i32, %arg1: i32) -> (i32, i32) {
    %c0_i32 = arith.constant 0 : i32
    %c0_i32_0 = arith.constant 0 : i32
    %c0_i32_1 = arith.constant 0 : i32
    return %c0_i32, %c0_i32_0 : i32, i32
  }
  func.func @transform_3(%arg0: i32, %arg1: i32) -> (i32, i32) {
    %c0_i32 = arith.constant 0 : i32
    %c0_i32_0 = arith.constant 0 : i32
    %c0_i32_1 = arith.constant 0 : i32
    return %c0_i32, %c0_i32_0 : i32, i32
  }
  func.func @transform_4(%arg0: i32, %arg1: i32) -> (i32, i32) {
    %c0_i32 = arith.constant 0 : i32
    %c0_i32_0 = arith.constant 0 : i32
    %c0_i32_1 = arith.constant 0 : i32
    return %c0_i32, %c0_i32_0 : i32, i32
  }
  func.func @transform_5(%arg0: i32, %arg1: i32) -> (i32, i32, i32) {
    %c0_i32 = arith.constant 0 : i32
    %c0_i32_0 = arith.constant 0 : i32
    return %arg0, %c0_i32, %arg1 : i32, i32, i32
  }
}

</mosaic_0001>

<bundles_post_ra>
// kernel: tpu_custom_call.1
= control target key start
LH: loop header
LB: loop body
LE: loop exit
PB: predicated region body
PF: predicated region fallthrough
CT: control target
= control target key end

     0   :  { %10 = vsyncpa [#allocation3], 0  ;;  %s873_s0 = inlined_call_operand.vmem [shape: f32[2,8,256], index: 0, kind: input, shape index: {}]   ;;  %s874_s1 = inlined_call_operand.vmem [shape: f32[32,8], index: 1, kind: input, shape index: {}]   ;;  %s875_s2 = inlined_call_operand.vmem [shape: f32[32,1], index: 2, kind: input, shape index: {}]   ;;  %s876_s3 = inlined_call_operand.vmem [shape: f32[16,32], index: 3, kind: input, shape index: {}]   ;;  %s877_s4 = inlined_call_operand.vmem [shape: f32[16,1], index: 4, kind: input, shape index: {}]   ;;  %s878_s5 = inlined_call_operand.hbm [shape: f32[2,16,256], index: 5, kind: output, shape index: {}]  }
   0x1   :  { %12 = vsyncpa [#allocation3 + $0x1], 0  ;;  %s722_s18 = smov 0   ;;  %s724_s19 = smov 0  }
   0x2   :  { %s726_s20 = smov 0   ;;  %s728_s21 = smov 0  }
   0x3   :  { %s730_s22 = smov 0   ;;  %s732_s23 = smov 0  }
   0x4 LB: > { %s529_s24 = sadd.s32 4294967295, %s686_s23   ;;  %s530_s25 = sadd.s32 4294967294, %s686_s23   ;;  %s686_s23 = sphi %s732_s23, %s18_s23   ;;  %s682_s22 = sphi %s730_s22, %s885_s22   ;;  %s678_s21 = sphi %s728_s21, %s884_s21   ;;  %s674_s20 = sphi %s726_s20, %s883_s20   ;;  %s670_s19 = sphi %s724_s19, %s882_s19   ;;  %s666_s18 = sphi %s722_s18, %s881_s18  }
   0x5   : > { %s30_s26 = sadd.s32 1, %s682_s22  ;;  %s151_s27 = sadd.s32 1, %s674_s20 }
   0x6   : > { %p32_p0 = scmp.ge.s32.totalorder %s30_s26, 2  ;;  %p161_p1 = scmp.ne.s32.totalorder %s674_s20, %s670_s19 }
   0x7   : > { %p162_p2 = scmp.eq.s32.totalorder %s529_s24, 1  ;;  %p167_p3 = scmp.ne.s32.totalorder %s670_s19, %s666_s18 }
   0x8   : > { %s887_s26 = smov (%p32_p0, %s30_s26), 0  ;;  %p168_p5 = scmp.eq.s32.totalorder %s530_s25, 1 }
   0x9   : > { %p762_p4 = por %p162_p2, %p161_p1  ;;  %s146_s29 = ssub.s32 %s682_s22, %s887_s26 }
   0xa   : > { %p533_p6 = scmp.ge.s32.totalorder %s686_s23, 1  ;;  %p149_p7 = scmp.eq.s32.totalorder %s146_s29, 0 }
   0xb   : > { %p769_p8 = por %p168_p5, %p167_p3  ;;  %p211_p9 = scmp.lt.s32.totalorder %s686_s23, 3 }
   0xc   : > { %s775_s6 = scalar_select %p149_p7, %s674_s20, %s151_s27  }
   0xd   : > { %p212_p10 = pnand %p533_p6, %p211_p9 }
   0xe   : > { %p244_p11 = scmp.lt.s32.totalorder (!%p212_p10), %s678_s21, 1  ;;  %v688_v0 = vmov (!%p212_p10), 0   ;;  %v268_v1 = vld [vmem:[%s875_s2] sm:$0xff] (!%p212_p10)  ;;  %v270_v2 = vld [vmem:[%s875_s2 + $0x10] sm:$0xff] (!%p212_p10)  ;;  %v269_v3 = vld [vmem:[%s875_s2 + $0x8] sm:$0xff] (!%p212_p10)  ;;  %vm299_vm0 = vcmask (!%p212_p10), 1043456  }
   0xf   : > { %215 = sbr.rel (%p212_p10) target bundleno = 498 (0x1f2), region = 40  ;;  %338 = vmatprep.mubr.bf16.mxu0 (!%p212_p10), %v688_v0  ;;  %606 = vset.pattern.permute.xlu0 (!%p212_p10), %v688_v0  ;;  %v271_v4 = vld [vmem:[%s875_s2 + $0x18] sm:$0xff] (!%p212_p10)  ;;  %v259_v5 = vld [vmem:[%s874_s1] sm:$0xff] (!%p212_p10)  ;;  %v260_v8 = vld [vmem:[%s874_s1 + $0x8] sm:$0xff] (!%p212_p10)  ;;  %vm292_vm1 = vcmask (!%p212_p10), 64512   ;;  %vm383_vm2 = vcmask (!%p212_p10), 261120  }
  0x10   : > { %274 = vperm.xlu0 (!%p212_p10), %606, %v268_v1   ;;  %607 = vset.pattern.permute.xlu1 (!%p212_p10), %v688_v0  ;;  %v371_v11 = vld [vmem:[%s877_s4] sm:$0xff] (!%p212_p10)  ;;  %v372_v12 = vld [vmem:[%s877_s4 + $0x8] sm:$0xff] (!%p212_p10)  ;;  %v263_v14 = vpack.c.bf16 (!%p212_p10), %v260_v8, %v259_v5  ;;  %v261_v15 = vld [vmem:[%s874_s1 + $0x10] sm:$0xff] (!%p212_p10)  ;;  %s240_s29 = sand.u32 (!%p212_p10), 1, %s670_s19   ;;  %s547_s10 = sshll.u32 (!%p212_p10), %s678_s21, 9 }
  0x11   : > { %284 = vperm.xlu1 (!%p212_p10), %607, %v270_v2   ;;  %419 = vmatprep.mubr.bf16.mxu1 (!%p212_p10), %v688_v0  ;;  %v262_v16 = vld [vmem:[%s874_s1 + $0x18] sm:$0xff] (!%p212_p10)  ;;  %v265_v49 = vld [vmem:[%s876_s3] sm:$0xff] (!%p212_p10)  ;;  %v266_v50 = vld [vmem:[%s876_s3 + $0x8] sm:$0xff] (!%p212_p10)  ;;  %s534_s7 = sshll.u32 (!%p212_p10), %s240_s29, 5  ;;  %s825_s13 = scalar_lea.hbm (!%p212_p10), %s878_s5, %s547_s10 }
  0x12   : > { %v264_v17 = vpack.c.bf16 (!%p212_p10), %v262_v16, %v261_v15  ;;  %v267_v52 = vpack.c.bf16 (!%p212_p10), %v266_v50, %v265_v49  ;;  %s242_s8 = scalar_lea.vmem (!%p212_p10), [#allocation2], %s534_s7  ;;  %s689_s15 = smov (!%p212_p10), [#allocation2]  }
  0x13   : > { %s612_s16 = sshll.u32 (!%p212_p10), %s689_s15, 4  ;;  %s613_s16 = int_to_ptr.vmem [resolvable:$false] %s612_s16 }
  0x14   : > { %279 = vperm.xlu0 (!%p212_p10), %606, %v269_v3   ;;  %s614_s17 = scalar_lea.vmem (!%p212_p10), %s613_s16, 1024 }
  0x15   : > { %289 = vperm.xlu1 (!%p212_p10), %607, %v271_v4  }
  0x16   : > { %s245_s9 = scalar_select %p244_p11, %s678_s21, 1 }
  0x17   : > { %s827_s21 = scalar_lea.sflag [#allocation3], %s240_s29 }
  0x18   : > { %s546_s14 = sshll.u32 %s245_s9, 4  ;;  %375 = vperm.xlu0 %606, %v371_v11   ;;  %s450_s9 = sshll.u32 %s242_s8, 4  ;;  %s820_s9 = int_to_ptr.vmem [resolvable:$true] %s450_s9 }
  0x19   : > { %s251_s25 = scalar_lea.vmem %s873_s0, %s546_s14  ;;  %380 = vperm.xlu1 %607, %v372_v12   ;;  %s608_s14 = scalar_lea.vmem %s820_s9, 512 }
  0x1a   : > { %v256_v6 = vld [vmem:[%s251_s25 + $0x8] sm:$0xff]  ;;  %v255_v7 = vld [vmem:[%s251_s25] sm:$0xff]  ;;  %p609_p12 = scmp.ne.s32.totalorder %s820_s9, %s608_s14  ;;  %p615_p1 = scmp.lt.s32.totalorder %s820_s9, %s613_s16 }
  0x1b   : > { %v258_v9 = vpack.c.bf16 %v256_v6, %v256_v6  ;;  %v257_v10 = vpack.c.bf16 %v255_v7, %v255_v7  ;;  %p616_p2 = scmp.lt.s32.totalorder %s614_s17, %s608_s14 }
  0x1c   : > { %p610_p13 = pnand %p609_p12, %p762_p4 }
  0x1d   : > { %537 = vmatprep.subr.msk.bf16.mxu0 %vm299_vm0, %v258_v9  ;;  %v301_v13 = vsel %vm299_vm0, %v257_v10, 0  ;;  %p617_p3 = por %p616_p2, %p615_p1 }
  0x1e   : > { %307 = vmatpush1.bf16.msra.mxu0 %v301_v13  ;;  %p611_p0 = pneg %p610_p13 }
  0x20   : > { %p618_p5 = pnand %p617_p3, %p611_p0 }
  0x21   : > { %538 = vmatmul.mubr.msk.bf16.vlgmr.msra.gmra.mrb[0].mxu0 %vm292_vm1, %v263_v14 }
  0x22   : > { %348 = vmatprep.mubr.bf16.mxu0 %v688_v0 }
  0x29   : > { %539 = vmatmul.mubr.msk.bf16.gmra.mrb[4].mxu0 %vm292_vm1, %v264_v17 }
  0x8f   : > { %v275_v18 = vpop.permute.xlu0 %274 }
  0x90   : > { %v285_v27 = vpop.permute.xlu1 %284 }
  0x93   : > { %v280_v22 = vpop.permute.xlu0 %279 }
  0x94   : > { %v290_v38 = vpop.permute.xlu1 %289 }
  0x97   : > { %v376_v53 = vpop.permute.xlu0 %375 }
  0x98   : > { %v381_v57 = vpop.permute.xlu1 %380 }
  0xf4   : > { %v340_v19 = vpop.f32.mrb[0].mxu0 }
  0xf5   : > { %v341_v20 = vadd.f32 %v340_v19, %v275_v18  ;;  %v342_v21 = vpop.f32.mrb[1].mxu0 }
  0xf6   : > { %v343_v23 = vadd.f32 %v342_v21, %v275_v18  ;;  %v344_v24 = vpop.f32.mrb[2].mxu0 }
  0xf7   : > { %v345_v25 = vadd.f32 %v344_v24, %v280_v22  ;;  %v346_v26 = vpop.f32.mrb[3].mxu0  ;;  %v359_v29 = vmax.f32 %v341_v20, 0.0 }
  0xf8   : > { %v347_v28 = vadd.f32 %v346_v26, %v280_v22  ;;  %v360_v31 = vmax.f32 %v343_v23, 0.0 }
  0xf9   : > { %v361_v30 = vmax.f32 %v345_v25, 0.0 }
  0xfa   : > { %v362_v32 = vmax.f32 %v347_v28, 0.0 }
  0xfb   : > { %v367_v33 = vpack.c.bf16 %v361_v30, %v359_v29 }
  0xfc   : > { %v350_v34 = vpop.f32.mrb[4].mxu0  ;;  %v368_v35 = vpack.c.bf16 %v362_v32, %v360_v31 }
  0xfd   : > { %v351_v36 = vadd.f32 %v350_v34, %v285_v27  ;;  %v352_v37 = vpop.f32.mrb[5].mxu0 }
  0xfe   : > { %v353_v39 = vadd.f32 %v352_v37, %v285_v27  ;;  %v354_v40 = vpop.f32.mrb[6].mxu0  ;;  %387 = vmatprep.subr.bf16.mxu1 %v368_v35 }
  0xff   : > { %v355_v41 = vadd.f32 %v354_v40, %v290_v38  ;;  %v356_v42 = vpop.f32.mrb[7].mxu0  ;;  %388 = vmatpush1.bf16.msra.mxu1 %v367_v33  ;;  %v363_v44 = vmax.f32 %v351_v36, 0.0 }
 0x100   : > { %v357_v43 = vadd.f32 %v356_v42, %v290_v38  ;;  %v364_v46 = vmax.f32 %v353_v39, 0.0 }
 0x101   : > { %v365_v45 = vmax.f32 %v355_v41, 0.0 }
 0x102   : > { %v366_v47 = vmax.f32 %v357_v43, 0.0 }
 0x103   : > { %v369_v48 = vpack.c.bf16 %v365_v45, %v363_v44 }
 0x104   : > { %v370_v51 = vpack.c.bf16 %v366_v47, %v364_v46 }
 0x106   : > { %389 = vmatprep.subr.bf16.mxu1 %v370_v51 }
 0x107   : > { %390 = vmatpush1.bf16.msra.mxu1 %v369_v48 }
 0x10a   : > { %540 = vmatmul.mubr.msk.bf16.vlgmr.msra.gmra.mrb[0].mxu1 %vm383_vm2, %v267_v52 }
 0x1dd   : > { %v421_v54 = vpop.f32.mrb[0].mxu1 }
 0x1de   : > { %v422_v55 = vadd.f32 %v421_v54, %v376_v53  ;;  %v423_v56 = vpop.f32.mrb[1].mxu1 }
 0x1df   : > { %v424_v58 = vadd.f32 %v423_v56, %v376_v53  ;;  %v425_v59 = vpop.f32.mrb[2].mxu1 }
 0x1e0   : > { %430 = vst [vmem:[%s242_s8] sm:$0xff] %v422_v55  ;;  %v426_v60 = vadd.f32 %v425_v59, %v381_v57  ;;  %v427_v61 = vpop.f32.mrb[3].mxu1 }
 0x1e1   : > { %431 = vst [vmem:[%s242_s8 + $0x8] sm:$0xff] %v424_v58  ;;  %v428_v62 = vadd.f32 %v427_v61, %v381_v57 }
 0x1e2   : > { %432 = vst [vmem:[%s242_s8 + $0x10] sm:$0xff] %v426_v60 }
 0x1e3   : > { %433 = vst [vmem:[%s242_s8 + $0x18] sm:$0xff] %v428_v62 }
 0x1e4   : > { %621 = shalt.err (!%p618_p5)
}
 0x1e5   : > { %s622_s24 = scalar_lea.hbm %s825_s13, 512  ;;  %s626_s29 = scalar_lea.hbm %s878_s5, 1024 }
 0x1e6   : > { %p623_p6 = scmp.ne.s32.totalorder %s825_s13, %s622_s24  ;;  %p627_p10 = scmp.lt.u32.totalorder %s825_s13, %s878_s5 }
 0x1e7   : > { %p628_p11 = scmp.lt.u32.totalorder %s626_s29, %s622_s24  ;;  %p630_p13 = scmp.lt.u32.totalorder %s622_s24, %s825_s13 }
 0x1e8   : > { %p624_p7 = pnand %p623_p6, %p762_p4 }
 0x1e9   : > { %p629_p12 = por %p628_p11, %p627_p10 }
 0x1ea   : > { %p625_p9 = pneg %p624_p7 }
 0x1eb   : > { %p631_p0 = por %p630_p13, %p629_p12 }
 0x1ed   : > { %p632_p1 = pnand %p631_p0, %p625_p9 }
 0x1ef   : > { %635 = shalt.err (!%p632_p1)
}
 0x1f0   : > { %s690_s10 = smov 256   ;;  %s691_s11 = smov 16  }
 0x1f1   : > { %548 = dma.vmem_to_hbm [thread:$0]  (%p762_p4), %s820_s9, 512, %s825_s13, %s827_s21, %s690_s10, %s690_s10, %s691_s11  }
 0x1f2 PF: > { %p554_p2 = scmp.ge.s32.totalorder %s686_s23, 2  ;;  %s465_s12 = sand.u32 1, %s666_s18  }
 0x1f3   : > { %s466_s14 = scalar_lea.sflag [#allocation3], %s465_s12 }
 0x1f4   : > { %p551_p3 = pnand %p554_p2, %p769_p8 }
 0x1f6   : > { %661 = dma.done.wait (!%p551_p3), %s466_s14, 512  }
 0x1f7   : > { %663 = vsyncadd (!%p551_p3), %s466_s14, 4294966784  ;;  %s18_s23 = sadd.s32 1, %s686_s23   ;;  %s881_s18 = smov %s670_s19 }
 0x1f8   : > { %p15_p5 = scmp.ge.s32.totalorder %s18_s23, 4   ;;  %s882_s19 = smov %s674_s20 }
 0x1f9   : > { %s883_s20 = smov %s775_s6  ;;  %s884_s21 = smov %s682_s22 }
 0x1fa   : > { %s885_s22 = smov %s887_s26  ;;  %17 = sbr.rel (!%p15_p5) target bundleno = 4 (0x4), region = 75 }
 0x201   :  { %471 = vsyncpa [#allocation3], 1 }
 0x202   :  { %473 = vsyncpa [#allocation3 + $0x1], 1 }

</bundles_post_ra>
